<compile_context>
chip_gen: v7x
topology: tpu7x:2x2x1
jax: 0.10.0
libtpu: 0.0.40
codegen_flags: <defaults>
</compile_context>

<pallas_src>
import functools
from typing import NamedTuple

import jax
import jax.numpy as jnp
from jax.experimental import pallas as pl
from jax.experimental.pallas import tpu as pltpu


def _round_up(x, m):
    return ((x + m - 1) // m) * m


def _sublane(dtype):
    # rows per packed sublane tile: f32 -> 8, bf16 -> 16, int8/fp8 -> 32
    return 8 * max(1, 4 // jnp.dtype(dtype).itemsize)


def _vmem_capacity_bytes():
    try:
        cap = int(pltpu.get_tpu_info().vmem_capacity_bytes)
        if cap > 0:
            return cap
    except Exception:
        pass
    try:
        kind = jax.devices()[0].device_kind.lower()
        return (64 << 20) if "v7" in kind else (128 << 20)
    except Exception:
        return 64 << 20  # conservative


# ---------------------------------------------------------------------------
# Path A: whole contraction (V_pad) in a single K block.  The (V_pad, tn)
# weight slab stays VMEM-resident while the inner grid axis sweeps row blocks.
# ---------------------------------------------------------------------------
def _fe_kernel_resident(x_ref, w_ref, o_ref):
    o_ref[...] = jnp.dot(
        x_ref[...], w_ref[...], preferred_element_type=jnp.float32
    ).astype(o_ref.dtype)


# ---------------------------------------------------------------------------
# Path B: tiled contraction, f32 output — accumulate directly into the
# VMEM-resident output block (its block index is constant across k).
# ---------------------------------------------------------------------------
def _fe_kernel_tiled_f32out(x_ref, w_ref, o_ref):
    @pl.when(pl.program_id(2) == 0)
    def _():
        o_ref[...] = jnp.zeros_like(o_ref)

    o_ref[...] += jnp.dot(
        x_ref[...], w_ref[...], preferred_element_type=jnp.float32
    )


# ---------------------------------------------------------------------------
# Path B: tiled contraction, non-f32 output — f32 scratch accumulator.
# ---------------------------------------------------------------------------
def _fe_kernel_tiled_acc(x_ref, w_ref, o_ref, acc_ref):
    @pl.when(pl.program_id(2) == 0)
    def _():
        acc_ref[...] = jnp.zeros_like(acc_ref)

    acc_ref[...] += jnp.dot(
        x_ref[...], w_ref[...], preferred_element_type=jnp.float32
    )

    @pl.when(pl.program_id(2) == pl.num_programs(2) - 1)
    def _():
        o_ref[...] = acc_ref[...].astype(o_ref.dtype)


class _Cfg(NamedTuple):
    single_k: bool
    tm: int
    tn: int
    tk: int
    M_pad: int
    V_pad: int
    D_pad: int
    D: int
    vmem_limit: int


@functools.partial(jax.jit, static_argnums=(2,))
def _frozen_embedding_apply(x, w, cfg: _Cfg):
    out_dtype = x.dtype
    lead = x.shape[:-1]
    V = x.shape[-1]
    x2 = x.reshape(-1, V)
    M = x2.shape[0]

    # cast + pad x; fused with the pallas custom-call inside one jitted program
    if x2.dtype != w.dtype:
        x2 = x2.astype(w.dtype)
    if (cfg.M_pad, cfg.V_pad) != x2.shape:
        x2 = jnp.pad(x2, ((0, cfg.M_pad - M), (0, cfg.V_pad - V)))

    tm, tn, tk = cfg.tm, cfg.tn, cfg.tk
    ni = cfg.M_pad // tm
    nj = cfg.D_pad // tn

    if cfg.single_k:
        out = pl.pallas_call(
            _fe_kernel_resident,
            out_shape=jax.ShapeDtypeStruct((cfg.M_pad, cfg.D_pad), out_dtype),
            grid_spec=pltpu.PrefetchScalarGridSpec(
                num_scalar_prefetch=0,
                grid=(nj, ni),  # j outer: weight slab reused across all i
                in_specs=[
                    pl.BlockSpec((tm, cfg.V_pad), lambda j, i: (i, 0)),
                    pl.BlockSpec((cfg.V_pad, tn), lambda j, i: (0, j)),
                ],
                out_specs=pl.BlockSpec((tm, tn), lambda j, i: (i, j)),
            ),
            compiler_params=pltpu.CompilerParams(
                dimension_semantics=("parallel", "parallel"),
                vmem_limit_bytes=cfg.vmem_limit,
            ),
        )(x2, w)
    else:
        nk = cfg.V_pad // tk
        if out_dtype == jnp.float32:
            kernel = _fe_kernel_tiled_f32out
            scratch = []
        else:
            kernel = _fe_kernel_tiled_acc
            scratch = [pltpu.VMEM((tm, tn), jnp.float32)]
        out = pl.pallas_call(
            kernel,
            out_shape=jax.ShapeDtypeStruct((cfg.M_pad, cfg.D_pad), out_dtype),
            grid_spec=pltpu.PrefetchScalarGridSpec(
                num_scalar_prefetch=0,
                grid=(ni, nj, nk),
                in_specs=[
                    pl.BlockSpec((tm, tk), lambda i, j, k: (i, k)),
                    pl.BlockSpec((tk, tn), lambda i, j, k: (k, j)),
                ],
                out_specs=pl.BlockSpec((tm, tn), lambda i, j, k: (i, j)),
                scratch_shapes=scratch,
            ),
            compiler_params=pltpu.CompilerParams(
                dimension_semantics=("parallel", "parallel", "arbitrary"),
                vmem_limit_bytes=cfg.vmem_limit,
            ),
        )(x2, w)

    out = out[:M, : cfg.D]
    return out.reshape(*lead, cfg.D)


class FrozenEmbedding:
    """y = x @ embedding_weights.  x: (..., V), W: (V, D) -> y: (..., D) in x.dtype."""

    def __init__(
        self,
        embedding_weights,
        *,
        compute_dtype=jnp.bfloat16,
        max_resident_k=None,
        block_m=None,
        block_n=None,
        block_k=None,
    ):
        V, D = embedding_weights.shape
        self.V, self.D = int(V), int(D)
        self.block_m, self.block_n, self.block_k = block_m, block_n, block_k

        vmem_cap = _vmem_capacity_bytes()
        self.vmem_limit = int(0.8 * vmem_cap)        # ~51 MiB v7x, ~102 MiB v5e/v6e
        self.tile_budget = int(0.85 * self.vmem_limit)
        self.is_v7x_like = vmem_cap <= (80 << 20)    # 64 MiB per-TC parts
        if max_resident_k is None:
            max_resident_k = 8192 if self.is_v7x_like else 16384
        self.max_resident_k = int(max_resident_k)

        # --- frozen table: cast + pad ONCE at module init, not per call ---
        w = embedding_weights
        if compute_dtype is not None and w.dtype != compute_dtype:
            w = w.astype(compute_dtype)
        V_pad = _round_up(self.V, 128)
        D_pad = _round_up(self.D, 128)
        if (V_pad, D_pad) != w.shape:
            w = jnp.pad(w, ((0, V_pad - self.V), (0, D_pad - self.D)))
        self.w = jax.block_until_ready(w)
        self.V_pad, self.D_pad = V_pad, D_pad
        self.cdtype = self.w.dtype
        # TODO(synk): optional fp8 (v7x) / int8 (v5e/v6e) offline quantization of
        # the frozen table with per-column scales would halve weight HBM traffic.

    def _make_cfg(self, M, out_dtype):
        isz = jnp.dtype(self.cdtype).itemsize
        osz = jnp.dtype(out_dtype).itemsize
        sub = max(_sublane(self.cdtype), _sublane(out_dtype))
        V_pad, D_pad = self.V_pad, self.D_pad
        budget = self.tile_budget

        def a_need(tm_, tn_):
            # double-buffered x tile + weight slab + output tile
            return 2 * (tm_ * V_pad + V_pad * tn_) * isz + 2 * tm_ * tn_ * osz

        tm = min(self.block_m or 256, _round_up(M, sub))
        single_k = (V_pad <= self.max_resident_k) and a_need(tm, 128) <= budget

        if single_k:
            ni = _round_up(M, tm) // tm
            # On v7x-like parts with a degenerate row grid, cap tn so the N axis
            # has >= 2 blocks: megacore then splits W disjointly across TCs.
            cap = D_pad // 2 if (self.is_v7x_like and ni == 1 and D_pad >= 256) else D_pad
            tn = 128
            for c in (D_pad, 2048, 1024, 512, 256, 128):
                if c <= cap and c <= D_pad and D_pad % c == 0 and a_need(tm, c) <= budget:
                    tn = c
                    break
            if self.block_n and D_pad % self.block_n == 0:
                tn = self.block_n
            tk = V_pad
        else:
            tm = min(self.block_m or 512, _round_up(M, sub))
            tn = next(c for c in (512, 256, 128) if D_pad % c == 0)
            if self.block_n and D_pad % self.block_n == 0:
                tn = self.block_n
            acc_bytes = 0 if out_dtype == jnp.float32 else tm * tn * 4

            def b_need(tk_):
                return 2 * (tm * tk_ + tk_ * tn) * isz + 2 * tm * tn * osz + acc_bytes

            tk = 128
            for c in (2048, 1024, 512, 256, 128):
                if c <= V_pad and V_pad % c == 0 and b_need(c) <= budget:
                    tk = c
                    break
            if self.block_k and V_pad % self.block_k == 0:
                tk = self.block_k

        M_pad = _round_up(M, tm)
        return _Cfg(single_k, tm, tn, tk, M_pad, V_pad, D_pad, self.D, self.vmem_limit)

    def __call__(self, x):
        assert x.shape[-1] == self.V, "last dim of x must equal embedding input dim V"
        M = 1
        for s in x.shape[:-1]:
            M *= int(s)
        cfg = self._make_cfg(max(M, 1), x.dtype)
        return _frozen_embedding_apply(x, self.w, cfg)


if __name__ == "__main__":
    key = jax.random.PRNGKey(0)
    kx, kw, kx2, kw2 = jax.random.split(key, 4)

    # --- Test 1: Path A (resident weight slab): bf16 compute + strict f32 ---
    B, S, V, D = 2, 8, 128, 256
    x = jax.random.normal(kx, (B, S, V), dtype=jnp.float32)
    W = jax.random.normal(kw, (V, D), dtype=jnp.float32) * 0.02
    y_ref = jnp.einsum("bsv,vd->bsd", x, W)

    fe = FrozenEmbedding(W)  # bf16 table cached (cast+pad once at init)
    y = fe(x)
    jax.block_until_ready(y)
    assert y.shape == (B, S, D) and y.dtype == jnp.float32
    assert jnp.allclose(y, y_ref, atol=2e-2, rtol=2e-2)

    fe_f32 = FrozenEmbedding(W, compute_dtype=None)  # strict f32 path
    y32 = fe_f32(x)
    jax.block_until_ready(y32)
    assert jnp.allclose(y32, y_ref, atol=1e-4, rtol=1e-4)

    # --- Test 2: Path B (tiled K, forced), non-divisible shapes, f32 output ---
    V2, D2 = 1000, 200
    x2 = jax.random.normal(kx2, (3, 5, V2), dtype=jnp.float32)
    W2 = jax.random.normal(kw2, (V2, D2), dtype=jnp.float32) * 0.02
    y2_ref = jnp.einsum("bsv,vd->bsd", x2, W2)
    fe2 = FrozenEmbedding(W2, max_resident_k=256, block_k=512)  # force tiled-K, nk=2
    y2 = fe2(x2)
    jax.block_until_ready(y2)
    assert y2.shape == (3, 5, D2) and y2.dtype == jnp.float32
    assert jnp.allclose(y2, y2_ref, atol=5e-2, rtol=5e-2)

    # --- Test 3: Path B with bf16 output (scratch-accumulator variant) ---
    y3 = fe2(x2.astype(jnp.bfloat16))
    jax.block_until_ready(y3)
    assert y3.shape == (3, 5, D2) and y3.dtype == jnp.bfloat16
    assert jnp.allclose(y3.astype(jnp.float32), y2_ref, atol=8e-2, rtol=8e-2)

    print("KERNEL_OK")
</pallas_src>

<mosaic_0001>
module attributes {stable_mosaic.version = 11 : i64} {
  func.func @_fe_kernel_resident(%arg0: i32, %arg1: i32, %arg2: memref<16x128xbf16, #tpu.memory_space<vmem>>, %arg3: memref<128x256xbf16, #tpu.memory_space<vmem>>, %arg4: memref<16x256xf32, #tpu.memory_space<vmem>>) attributes {dimension_semantics = [#tpu.dimension_semantics<parallel>, #tpu.dimension_semantics<parallel>], iteration_bounds = array<i64: 1, 1>, scalar_prefetch = 0 : i64, scratch_operands = 0 : i64, tpu.core_type = #tpu.core_type<tc>, window_params = [{transform_indices = @transform_0, window_bounds = array<i64: 16, 128>}, {transform_indices = @transform_1, window_bounds = array<i64: 128, 256>}, {transform_indices = @transform_2, window_bounds = array<i64: 16, 256>}]} {
    %c0 = arith.constant 0 : index
    %c0_0 = arith.constant 0 : index
    %0 = vector.load %arg2[%c0, %c0_0] : memref<16x128xbf16, #tpu.memory_space<vmem>>, vector<16x128xbf16>
    %c0_1 = arith.constant 0 : index
    %c0_2 = arith.constant 0 : index
    %1 = vector.load %arg3[%c0_1, %c0_2] : memref<128x256xbf16, #tpu.memory_space<vmem>>, vector<128x256xbf16>
    %cst = arith.constant dense<0.000000e+00> : vector<16x256xf32>
    %2 = tpu.matmul %0, %1, %cst {dimension_numbers = #tpu.dot_dimension_numbers<[1], [0], [0], [1], [0, 0, 1, 1], [], []>} : vector<16x128xbf16>, vector<128x256xbf16>, vector<16x256xf32> -> vector<16x256xf32>
    %c0_3 = arith.constant 0 : index
    %c0_4 = arith.constant 0 : index
    %3 = vector.load %arg4[%c0_3, %c0_4] : memref<16x256xf32, #tpu.memory_space<vmem>>, vector<16x256xf32>
    tpu.vector_store %arg4[%c0_3, %c0_4], %2 {strides = array<i32>} : memref<16x256xf32, #tpu.memory_space<vmem>>, vector<16x256xf32>,
    return
  }
  func.func @transform_0(%arg0: i32, %arg1: i32) -> (i32, i32) {
    %c0_i32 = arith.constant 0 : i32
    %c0_i32_0 = arith.constant 0 : i32
    return %arg1, %c0_i32 : i32, i32
  }
  func.func @transform_1(%arg0: i32, %arg1: i32) -> (i32, i32) {
    %c0_i32 = arith.constant 0 : i32
    %c0_i32_0 = arith.constant 0 : i32
    return %c0_i32, %arg0 : i32, i32
  }
  func.func @transform_2(%arg0: i32, %arg1: i32) -> (i32, i32) {
    %c0_i32 = arith.constant 0 : i32
    return %arg1, %arg0 : i32, i32
  }
}

</mosaic_0001>

<bundles_post_ra>
// kernel: _frozen_embedding_apply.1
= control target key start
LH: loop header
LB: loop body
LE: loop exit
PB: predicated region body
PF: predicated region fallthrough
CT: control target
= control target key end

     0   :  { %7 = vsyncpa [#allocation3], 0  ;;  %s395_s0 = inlined_call_operand.hbm [shape: bf16[16,128], index: 0, kind: input, shape index: {}]   ;;  %s396_s1 = inlined_call_operand.hbm [shape: bf16[128,256], index: 1, kind: input, shape index: {}]   ;;  %s397_s2 = inlined_call_operand.hbm [shape: f32[16,256], index: 2, kind: output, shape index: {}]  }
   0x1   :  { %8 = vsyncpa [#allocation6], 0 }
   0x2   :  { %9 = vsyncpa [#allocation4], 0  ;;  %s334_s9 = smov [#allocation2]   ;;  %s262_s13 = scalar_lea.hbm %s395_s0, 128 }
   0x3   :  { %s15_s10 = sshll.u32 %s334_s9, 4  ;;  %p263_p0 = scmp.ne.s32.totalorder %s395_s0, %s262_s13  ;;  %s16_s10 = int_to_ptr.vmem [resolvable:$true] %s15_s10 }
   0x4   :  { %p266_p1 = scmp.lt.u32.totalorder %s262_s13, %s395_s0 }
   0x6   :  { %p268_p2 = pnand %p266_p1, %p263_p0 }
   0x8   :  { %271 = shalt.err (!%p268_p2)
}
   0x9   :  { %s272_s18 = scalar_lea.vmem %s16_s10, 128  ;;  %p277_p4 = scmp.lt.s32.totalorder %s16_s10, %s16_s10 }
   0xa   :  { %p273_p3 = scmp.ne.s32.totalorder %s16_s10, %s272_s18  ;;  %p278_p5 = scmp.lt.s32.totalorder %s272_s18, %s272_s18 }
   0xc   :  { %p279_p6 = por %p278_p5, %p277_p4 }
   0xe   :  { %p280_p7 = pnand %p279_p6, %p273_p3 }
  0x10   :  { %283 = shalt.err (!%p280_p7)
}
  0x11   :  { %s335_s19 = smov 64   ;;  %s336_s20 = smov 4  }
  0x12   :  { %21 = dma.hbm_to_vmem [thread:$0]  %s395_s0, 128, %s16_s10, [#allocation3], %s335_s19, %s335_s19, %s336_s20  }
  0x13   :  { %s337_s23 = smov [#allocation5]   ;;  %s284_s27 = scalar_lea.hbm %s396_s1, 2048 }
  0x14   :  { %s27_s24 = sshll.u32 %s337_s23, 4  ;;  %p285_p8 = scmp.ne.s32.totalorder %s396_s1, %s284_s27  ;;  %s28_s24 = int_to_ptr.vmem [resolvable:$true] %s27_s24 }
  0x15   :  { %p288_p9 = scmp.lt.u32.totalorder %s284_s27, %s396_s1 }
  0x17   :  { %p290_p10 = pnand %p288_p9, %p285_p8 }
  0x19   :  { %293 = shalt.err (!%p290_p10)
}
  0x1a   :  { %s294_s4 = scalar_lea.vmem %s28_s24, 2048  ;;  %p299_p12 = scmp.lt.s32.totalorder %s28_s24, %s28_s24 }
  0x1b   :  { %p295_p11 = scmp.ne.s32.totalorder %s28_s24, %s294_s4  ;;  %p300_p13 = scmp.lt.s32.totalorder %s294_s4, %s294_s4 }
  0x1d   :  { %p301_p0 = por %p300_p13, %p299_p12 }
  0x1f   :  { %p302_p1 = pnand %p301_p0, %p295_p11 }
  0x21   :  { %305 = shalt.err (!%p302_p1)
}
  0x22   :  { %s338_s0 = smov 128   ;;  %s339_s5 = smov 8  }
  0x23   :  { %33 = dma.hbm_to_vmem [thread:$0]  %s396_s1, 2048, %s28_s24, [#allocation6], %s338_s0, %s338_s0, %s339_s5  }
  0x24   :  { %328 = dma.done.wait [#allocation3], 128  }
  0x25   :  { %329 = vsyncadd [#allocation3], 4294967168 }
  0x26   :  { %330 = dma.done.wait [#allocation6], 2048  }
  0x27   :  { %331 = vsyncadd [#allocation6], 4294965248  ;;  %v340_v0 = vmov 0   ;;  %v237_v1 = vld [vmem:[#allocation5 + $0x4] ss:$8 sps:$4 sm:$0xff]   ;;  %v261_v17 = vld [vmem:[#allocation2] sm:$0xff]  }
  0x28   :  { %177 = vmatprep.mubr.bf16.mxu0 %v340_v0  ;;  %v239_v2 = vld [vmem:[#allocation5] ss:$8 sps:$4 sm:$0xff]   ;;  %145 = vmatprep.subr.bf16.mxu0 %v237_v1  ;;  %v240_v3 = vld [vmem:[#allocation5 + $0x14] ss:$8 sps:$4 sm:$0xff]   ;;  %v242_v4 = vld [vmem:[#allocation5 + $0x10] ss:$8 sps:$4 sm:$0xff]  }
  0x29   :  { %146 = vmatpush1.bf16.msra.mxu0 %v239_v2  ;;  %v243_v5 = vld [vmem:[#allocation5 + $0x24] ss:$8 sps:$4 sm:$0xff]   ;;  %v245_v6 = vld [vmem:[#allocation5 + $0x20] ss:$8 sps:$4 sm:$0xff]   ;;  %v246_v7 = vld [vmem:[#allocation5 + $0x34] ss:$8 sps:$4 sm:$0xff]  }
  0x2a   :  { %147 = vmatprep.subr.bf16.mxu0 %v240_v3  ;;  %v248_v8 = vld [vmem:[#allocation5 + $0x30] ss:$8 sps:$4 sm:$0xff]   ;;  %v249_v9 = vld [vmem:[#allocation5 + $0x44] ss:$8 sps:$4 sm:$0xff]   ;;  %v251_v10 = vld [vmem:[#allocation5 + $0x40] ss:$8 sps:$4 sm:$0xff]  }
  0x2b   :  { %v252_v11 = vld [vmem:[#allocation5 + $0x54] ss:$8 sps:$4 sm:$0xff]   ;;  %v254_v12 = vld [vmem:[#allocation5 + $0x50] ss:$8 sps:$4 sm:$0xff]   ;;  %v255_v13 = vld [vmem:[#allocation5 + $0x64] ss:$8 sps:$4 sm:$0xff]  }
  0x2c   :  { %v257_v14 = vld [vmem:[#allocation5 + $0x60] ss:$8 sps:$4 sm:$0xff]   ;;  %v258_v15 = vld [vmem:[#allocation5 + $0x74] ss:$8 sps:$4 sm:$0xff]   ;;  %v260_v16 = vld [vmem:[#allocation5 + $0x70] ss:$8 sps:$4 sm:$0xff]  }
  0x2d   :  { %148 = vmatpush1.bf16.msra.mxu0 %v242_v4  ;;  %s341_s1 = smov [#allocation7]  }
  0x2e   :  { %149 = vmatprep.subr.bf16.mxu0 %v243_v5  ;;  %s197_s8 = sshll.u32 %s341_s1, 4  ;;  %s198_s8 = int_to_ptr.vmem [resolvable:$true] %s197_s8 }
  0x2f   :  { %s306_s9 = scalar_lea.vmem %s198_s8, 512  ;;  %p311_p3 = scmp.lt.s32.totalorder %s198_s8, %s198_s8 }
  0x30   :  { %p307_p2 = scmp.ne.s32.totalorder %s198_s8, %s306_s9  ;;  %p312_p4 = scmp.lt.s32.totalorder %s306_s9, %s306_s9 }
  0x31   :  { %150 = vmatpush1.bf16.msra.mxu0 %v245_v6 }
  0x32   :  { %151 = vmatprep.subr.bf16.mxu0 %v246_v7  ;;  %p313_p5 = por %p312_p4, %p311_p3 }
  0x34   :  { %p314_p6 = pnand %p313_p5, %p307_p2 }
  0x35   :  { %152 = vmatpush1.bf16.msra.mxu0 %v248_v8 }
  0x36   :  { %153 = vmatprep.subr.bf16.mxu0 %v249_v9 }
  0x39   :  { %154 = vmatpush1.bf16.msra.mxu0 %v251_v10 }
  0x3a   :  { %155 = vmatprep.subr.bf16.mxu0 %v252_v11 }
  0x3d   :  { %156 = vmatpush1.bf16.msra.mxu0 %v254_v12 }
  0x3e   :  { %157 = vmatprep.subr.bf16.mxu0 %v255_v13 }
  0x41   :  { %158 = vmatpush1.bf16.msra.mxu0 %v257_v14 }
  0x42   :  { %159 = vmatprep.subr.bf16.mxu0 %v258_v15 }
  0x45   :  { %160 = vmatpush1.bf16.msra.mxu0 %v260_v16 }
  0x48   :  { %178 = vmatmul.mubr.bf16.vlgmr.msra.gmra.mrb[0].mxu0 %v261_v17 }
 0x11b   :  { %v179_v18 = vpop.f32.mrb[0].mxu0 }
 0x11c   :  { %188 = vst [vmem:[#allocation7] sm:$0xff] %v179_v18  ;;  %v181_v19 = vpop.f32.mrb[1].mxu0 }
 0x11d   :  { %189 = vst [vmem:[#allocation7 + $0x8] sm:$0xff] %v181_v19  ;;  %v183_v20 = vpop.f32.mrb[2].mxu0 }
 0x11e   :  { %190 = vst [vmem:[#allocation7 + $0x10] sm:$0xff] %v183_v20  ;;  %v185_v21 = vpop.f32.mrb[3].mxu0 }
 0x11f   :  { %191 = vst [vmem:[#allocation7 + $0x18] sm:$0xff] %v185_v21 }
 0x120   :  { %317 = shalt.err (!%p314_p6)
}
 0x121   :  { %s318_s12 = scalar_lea.hbm %s397_s2, 512 }
 0x122   :  { %p319_p7 = scmp.ne.s32.totalorder %s397_s2, %s318_s12  ;;  %p322_p8 = scmp.lt.u32.totalorder %s318_s12, %s397_s2 }
 0x124   :  { %p324_p9 = pnand %p322_p8, %p319_p7 }
 0x126   :  { %327 = shalt.err (!%p324_p9)
}
 0x127   :  { %s342_s17 = smov 256   ;;  %s343_s18 = smov 16  }
 0x128   :  { %203 = dma.vmem_to_hbm [thread:$0]  %s198_s8, 512, %s397_s2, [#allocation4], %s342_s17, %s342_s17, %s343_s18  }
 0x129   :  { %332 = dma.done.wait [#allocation4], 512  }
 0x12a   :  { %333 = vsyncadd [#allocation4], 4294966784 }
 0x12b   :  { %207 = vsyncpa [#allocation3], 1 }
 0x12c   :  { %208 = vsyncpa [#allocation6], 1 }
 0x12d   :  { %209 = vsyncpa [#allocation4], 1 }

</bundles_post_ra>
